<compile_context>
chip_gen: v5e
topology: v5e:2x2
jax: 0.10.0
libtpu: 0.0.40
codegen_flags: <defaults>
</compile_context>

<pallas_src>
import jax
import jax.numpy as jnp
from jax.experimental import pallas as pl
from jax.experimental.pallas import tpu as pltpu

# ~2 MiB per input block => <=4 MiB double-buffered: comfortably inside v5e's
# 16 MiB scoped-VMEM default and v7x's 32 MiB scoped / 64 MiB physical VMEM.
_BLOCK_BYTE_BUDGET = 2 * 1024 * 1024


def _pick_tile(extent, unit, max_tile, min_steps):
    """Tile size along one axis: a multiple of `unit` that divides `extent`,
    is <= max_tile, and (if possible) yields >= min_steps grid steps."""
    if extent % unit != 0:
        return extent                      # full extent: always legal per the (8,128) rule
    divisors = [d for d in range(unit, extent + 1, unit) if extent % d == 0]
    fitting = [d for d in divisors if d <= max_tile] or [unit]
    enough = [d for d in fitting if extent // d >= min_steps]
    if enough:
        return max(enough)                 # biggest block that still pipelines well
    return min(fitting)                    # can't reach min_steps: take the most steps we can


def _make_kernel(hw_total):
    inv_hw = 1.0 / float(hw_total)         # full H*W as a constant, not the block lane extent

    def kernel(w_ref, x_ref, o_ref, max_sc, sum_sc):
        # w_ref  : SMEM f32[2] = conv center taps [w[0,0,p,p], w[0,1,p,p]] (exact)
        # x_ref  : VMEM (tb, hw_chunk) tile -- batch rows on sublanes, spatial on lanes
        # o_ref  : VMEM (tb, 1) attention value per batch row
        # max_sc / sum_sc : VMEM (tb, 1) f32 running spatial max / sum
        kk = pl.program_id(1)

        @pl.when(kk == 0)
        def _():
            max_sc[...] = jnp.full_like(max_sc, -jnp.inf)
            sum_sc[...] = jnp.zeros_like(sum_sc)

        x = x_ref[...].astype(jnp.float32)                       # f32 accumulation
        max_sc[...] = jnp.maximum(max_sc[...], jnp.max(x, axis=-1, keepdims=True))
        sum_sc[...] = sum_sc[...] + jnp.sum(x, axis=-1, keepdims=True)

        @pl.when(kk == pl.num_programs(1) - 1)
        def _():
            logit = w_ref[0] * max_sc[...] + w_ref[1] * (sum_sc[...] * inv_hw)
            o_ref[...] = jax.nn.sigmoid(logit).astype(o_ref.dtype)

    return kernel


def spatial_attention_forward(x, w_conv, *, block_byte_budget=_BLOCK_BYTE_BUDGET):
    """x: (B, C, H, W); w_conv: (1, 2, k, k) = Conv2d(2, 1, k, bias=False) weight.
    Returns the sigmoid spatial-attention map, shape (B, 1, 1, 1)."""
    B, C, H, W = x.shape
    k = w_conv.shape[-1]
    pd = (k - 1) // 2

    # Conv2d(in_channels=2) after the channel-dim concat => the module needs C == 1.
    assert C == 1, "SpatialAttention's Conv2d(in_channels=2) requires C == 1"
    assert k % 2 == 1, "odd kernel_size required (as the PyTorch module implies)"

    # 1x1 conv input + zero padding => only the center taps contribute (exact).
    w_center = w_conv[0, :, pd, pd].astype(jnp.float32)           # (2,) -> SMEM

    HW = H * W
    x2 = x.reshape(B, HW)          # batch on sublanes, flattened spatial on lanes
    itemsize = x2.dtype.itemsize

    # Lane (HW) tile: keep the full extent unless even an 8-row block would blow
    # the block budget; then carve 128-lane-multiple chunks (>=2 steps).
    if 8 * HW * itemsize > block_byte_budget and HW % 128 == 0:
        hw_chunk = _pick_tile(HW, 128, max(128, block_byte_budget // (8 * itemsize)),
                              min_steps=2)
    else:
        hw_chunk = HW   # TODO(synk): huge HW not divisible by 128 falls back to one big lane block.

    # Sublane (batch) tile: multiple of 8, block <= budget, >= 4 steps when
    # possible so v7x's two TensorCores each get >= 2 pipelined steps.
    row_budget = max(8, block_byte_budget // (hw_chunk * itemsize))
    tb = _pick_tile(B, 8, row_budget, min_steps=4)

    nb, nk = B // tb, HW // hw_chunk

    if nb * nk == 1:
        # Single step: no point allocating a second (double-buffer) input buffer.
        x_spec = pl.BlockSpec((tb, hw_chunk), lambda b, kk: (b, kk),
                              pipeline_mode=pl.Buffered(1))
    else:
        x_spec = pl.BlockSpec((tb, hw_chunk), lambda b, kk: (b, kk))

    out2 = pl.pallas_call(
        _make_kernel(HW),
        out_shape=jax.ShapeDtypeStruct((B, 1), x.dtype),
        grid=(nb, nk),
        in_specs=[
            pl.BlockSpec(memory_space=pltpu.MemorySpace.SMEM),    # conv center taps
            x_spec,                                               # batch-row x HW-chunk tile
        ],
        out_specs=pl.BlockSpec((tb, 1), lambda b, kk: (b, 0)),
        scratch_shapes=[
            pltpu.VMEM((tb, 1), jnp.float32),   # running spatial max
            pltpu.VMEM((tb, 1), jnp.float32),   # running spatial sum
        ],
        compiler_params=pltpu.CompilerParams(
            dimension_semantics=("parallel", "arbitrary")),
    )(w_center, x2)

    return out2.reshape(B, 1, 1, 1)


def spatial_attention_reference(x, w_conv):
    """Pure-JAX mirror of the PyTorch forward (including the real padded conv)."""
    k = w_conv.shape[-1]
    pd = (k - 1) // 2
    out_max = jnp.max(x, axis=(2, 3), keepdims=True)
    out_avg = jnp.mean(x, axis=(2, 3), keepdims=True)
    cat = jnp.concatenate([out_max, out_avg], axis=1)             # (B, 2C, 1, 1)
    out = jax.lax.conv_general_dilated(
        cat, w_conv, window_strides=(1, 1),
        padding=[(pd, pd), (pd, pd)],
        dimension_numbers=("NCHW", "OIHW", "NCHW"))
    return jax.nn.sigmoid(out)


if __name__ == "__main__":
    key = jax.random.PRNGKey(0)
    kx, kw = jax.random.split(key, 2)

    # Shapes the forward implies: the Conv2d(in_channels=2) after the channel
    # concat forces C == 1; kernel_size = 7 is the usual CBAM choice.
    B, C, H, W = 16, 1, 16, 16
    kernel_size = 7

    x = jax.random.normal(kx, (B, C, H, W), dtype=jnp.float32)
    w_conv = 0.1 * jax.random.normal(kw, (1, 2, kernel_size, kernel_size),
                                     dtype=jnp.float32)

    ref = spatial_attention_reference(x, w_conv)

    # Default tiling: batch split into multiple-of-8-row "parallel" blocks.
    out = spatial_attention_forward(x, w_conv)
    out = jax.block_until_ready(out)
    assert out.shape == (B, 1, 1, 1)
    assert jnp.allclose(out, ref, atol=1e-5, rtol=1e-5)

    # Exercise the HW-tiled (running max / running sum, "arbitrary" last axis)
    # path by shrinking the per-block byte budget -- same math, 2x2 grid.
    out_tiled = spatial_attention_forward(x, w_conv, block_byte_budget=4096)
    out_tiled = jax.block_until_ready(out_tiled)
    assert jnp.allclose(out_tiled, ref, atol=1e-5, rtol=1e-5)

    print("KERNEL_OK")
</pallas_src>

<mosaic_0001>
module attributes {stable_mosaic.version = 11 : i64} {
  func.func @kernel(%arg0: i32, %arg1: i32, %arg2: memref<2xf32, #tpu.memory_space<smem>>, %arg3: memref<8x256xf32, #tpu.memory_space<vmem>>, %arg4: memref<8x1xf32, #tpu.memory_space<vmem>>, %arg5: memref<8x1xf32, #tpu.memory_space<vmem>>, %arg6: memref<8x1xf32, #tpu.memory_space<vmem>>) attributes {dimension_semantics = [#tpu.dimension_semantics<parallel>, #tpu.dimension_semantics<arbitrary>], iteration_bounds = array<i64: 2, 1>, scalar_prefetch = 0 : i64, scratch_operands = 2 : i64, tpu.core_type = #tpu.core_type<tc>, window_params = [{transform_indices = @transform_0, window_bounds = array<i64: 2>}, {transform_indices = @transform_1, window_bounds = array<i64: 8, 256>}, {transform_indices = @transform_2, window_bounds = array<i64: 8, 1>}]} {
    %c0_i32 = arith.constant 0 : i32
    %0 = arith.cmpi eq, %arg1, %c0_i32 : i32
    %1 = arith.extui %0 : i1 to i32
    %c0_i32_0 = arith.constant 0 : i32
    %2 = arith.cmpi ne, %1, %c0_i32_0 : i32
    scf.if %2 {
      %cst_13 = arith.constant 0xFF800000 : f32
      %17 = vector.broadcast %cst_13 : f32 to vector<8x1xf32>
      %c0_14 = arith.constant 0 : index
      %c0_15 = arith.constant 0 : index
      %18 = vector.load %arg5[%c0_14, %c0_15] : memref<8x1xf32, #tpu.memory_space<vmem>>, vector<8x1xf32>
      tpu.vector_store %arg5[%c0_14, %c0_15], %17 {strides = array<i32>} : memref<8x1xf32, #tpu.memory_space<vmem>>, vector<8x1xf32>,
      %cst_16 = arith.constant 0.000000e+00 : f32
      %19 = vector.broadcast %cst_16 : f32 to vector<8x1xf32>
      %c0_17 = arith.constant 0 : index
      %c0_18 = arith.constant 0 : index
      %20 = vector.load %arg6[%c0_17, %c0_18] : memref<8x1xf32, #tpu.memory_space<vmem>>, vector<8x1xf32>
      tpu.vector_store %arg6[%c0_17, %c0_18], %19 {strides = array<i32>} : memref<8x1xf32, #tpu.memory_space<vmem>>, vector<8x1xf32>,
    } else {
    }
    %c0 = arith.constant 0 : index
    %c0_1 = arith.constant 0 : index
    %3 = vector.load %arg3[%c0, %c0_1] : memref<8x256xf32, #tpu.memory_space<vmem>>, vector<8x256xf32>
    %c0_2 = arith.constant 0 : index
    %c0_3 = arith.constant 0 : index
    %4 = vector.load %arg5[%c0_2, %c0_3] : memref<8x1xf32, #tpu.memory_space<vmem>>, vector<8x1xf32>
    %cst = arith.constant dense<0xFF800000> : vector<8xf32>
    %5 = vector.multi_reduction <maximumf>, %3, %cst [1] : vector<8x256xf32> to vector<8xf32>
    %6 = vector.shape_cast %5 : vector<8xf32> to vector<8x1xf32>
    %7 = arith.maximumf %4, %6 : vector<8x1xf32>
    %c0_4 = arith.constant 0 : index
    %c0_5 = arith.constant 0 : index
    %8 = vector.load %arg5[%c0_4, %c0_5] : memref<8x1xf32, #tpu.memory_space<vmem>>, vector<8x1xf32>
    tpu.vector_store %arg5[%c0_4, %c0_5], %7 {strides = array<i32>} : memref<8x1xf32, #tpu.memory_space<vmem>>, vector<8x1xf32>,
    %c0_6 = arith.constant 0 : index
    %c0_7 = arith.constant 0 : index
    %9 = vector.load %arg6[%c0_6, %c0_7] : memref<8x1xf32, #tpu.memory_space<vmem>>, vector<8x1xf32>
    %cst_8 = arith.constant dense<0.000000e+00> : vector<8xf32>
    %10 = vector.multi_reduction <add>, %3, %cst_8 [1] : vector<8x256xf32> to vector<8xf32>
    %11 = vector.shape_cast %10 : vector<8xf32> to vector<8x1xf32>
    %12 = arith.addf %9, %11 : vector<8x1xf32>
    %c0_9 = arith.constant 0 : index
    %c0_10 = arith.constant 0 : index
    %13 = vector.load %arg6[%c0_9, %c0_10] : memref<8x1xf32, #tpu.memory_space<vmem>>, vector<8x1xf32>
    tpu.vector_store %arg6[%c0_9, %c0_10], %12 {strides = array<i32>} : memref<8x1xf32, #tpu.memory_space<vmem>>, vector<8x1xf32>,
    %c0_i32_11 = arith.constant 0 : i32
    %14 = arith.cmpi eq, %arg1, %c0_i32_11 : i32
    %15 = arith.extui %14 : i1 to i32
    %c0_i32_12 = arith.constant 0 : i32
    %16 = arith.cmpi ne, %15, %c0_i32_12 : i32
    scf.if %16 {
      %c0_13 = arith.constant 0 : index
      %17 = memref.load %arg2[%c0_13] : memref<2xf32, #tpu.memory_space<smem>>
      %c0_14 = arith.constant 0 : index
      %c0_15 = arith.constant 0 : index
      %18 = vector.load %arg5[%c0_14, %c0_15] : memref<8x1xf32, #tpu.memory_space<vmem>>, vector<8x1xf32>
      %19 = vector.broadcast %17 : f32 to vector<8x1xf32>
      %20 = arith.mulf %19, %18 : vector<8x1xf32>
      %c1 = arith.constant 1 : index
      %21 = memref.load %arg2[%c1] : memref<2xf32, #tpu.memory_space<smem>>
      %c0_16 = arith.constant 0 : index
      %c0_17 = arith.constant 0 : index
      %22 = vector.load %arg6[%c0_16, %c0_17] : memref<8x1xf32, #tpu.memory_space<vmem>>, vector<8x1xf32>
      %cst_18 = arith.constant 3.906250e-03 : f32
      %23 = vector.broadcast %cst_18 : f32 to vector<8x1xf32>
      %24 = arith.mulf %22, %23 : vector<8x1xf32>
      %25 = vector.broadcast %21 : f32 to vector<8x1xf32>
      %26 = arith.mulf %25, %24 : vector<8x1xf32>
      %27 = arith.addf %20, %26 : vector<8x1xf32>
      %28 = arith.negf %27 : vector<8x1xf32>
      %29 = math.exp %28 : vector<8x1xf32>
      %cst_19 = arith.constant 1.000000e+00 : f32
      %30 = vector.broadcast %cst_19 : f32 to vector<8x1xf32>
      %31 = arith.addf %30, %29 : vector<8x1xf32>
      %32 = arith.divf %30, %31 : vector<8x1xf32>
      %c0_20 = arith.constant 0 : index
      %c0_21 = arith.constant 0 : index
      %33 = vector.load %arg4[%c0_20, %c0_21] : memref<8x1xf32, #tpu.memory_space<vmem>>, vector<8x1xf32>
      tpu.vector_store %arg4[%c0_20, %c0_21], %32 {strides = array<i32>} : memref<8x1xf32, #tpu.memory_space<vmem>>, vector<8x1xf32>,
    } else {
    }
    return
  }
  func.func @transform_0(%arg0: i32, %arg1: i32) -> i32 {
    %c0_i32 = arith.constant 0 : i32
    %c0_i32_0 = arith.constant 0 : i32
    return %c0_i32 : i32
  }
  func.func @transform_1(%arg0: i32, %arg1: i32) -> (i32, i32) {
    %c0_i32 = arith.constant 0 : i32
    return %arg0, %arg1 : i32, i32
  }
  func.func @transform_2(%arg0: i32, %arg1: i32) -> (i32, i32) {
    %c0_i32 = arith.constant 0 : i32
    %c0_i32_0 = arith.constant 0 : i32
    return %arg0, %c0_i32 : i32, i32
  }
}

</mosaic_0001>

<bundles_post_ra>
// kernel: tpu_custom_call.1
= control target key start
LH: loop header
LB: loop body
LE: loop exit
PB: predicated region body
PF: predicated region fallthrough
CT: control target
= control target key end

     0   :  { %7 = vsyncpa [#allocation6], 0  ;;  %s654_s0 = inlined_call_operand.hbm [shape: f32[2], index: 0, kind: input, shape index: {}]   ;;  %s655_s1 = inlined_call_operand.hbm [shape: f32[16,256], index: 1, kind: input, shape index: {}]   ;;  %s656_s2 = inlined_call_operand.vmem [shape: f32[16,1], index: 2, kind: output, shape index: {}]  }
   0x1   :  { %8 = vsyncpa [#allocation5], 0 }
   0x2   :  { %10 = vsyncpa [#allocation5 + $0x1], 0  ;;  %s544_s9 = smov 0   ;;  %s546_s10 = smov 0  }
   0x3   :  { %s548_s11 = smov 0   ;;  %s550_s12 = smov 0  }
   0x4   :  { %s552_s13 = smov 0   ;;  %s554_s14 = smov 0  }
   0x5 LB: > { %s336_s15 = sadd.s32 4294967295, %s524_s14   ;;  %p71_p0 = scmp.ne.s32.totalorder %s508_s10, %s504_s9  ;;  %s524_s14 = sphi %s554_s14, %s16_s14   ;;  %s520_s13 = sphi %s552_s13, %s664_s13   ;;  %s516_s12 = sphi %s550_s12, %s663_s12   ;;  %s512_s11 = sphi %s548_s11, %s662_s11   ;;  %s508_s10 = sphi %s546_s10, %s661_s10   ;;  %s504_s9 = sphi %s544_s9, %s660_s9  }
   0x6   : > { %p574_p1 = scmp.eq.s32.totalorder %s336_s15, 0  ;;  %p338_p2 = scmp.ge.s32.totalorder %s524_s14, 1 }
   0x7   : > { %p108_p3 = scmp.lt.s32.totalorder %s524_s14, 3  ;;  %s120_s20 = sshll.u32 %s654_s0, 4  ;;  %s121_s20 = int_to_ptr.hbm [resolvable:$true] %s120_s20 }
   0x8   : > { %p582_p4 = por %p574_p1, %p71_p0  ;;  %s28_s22 = sadd.s32 1, %s520_s13 }
   0x9   : > { %p589_p5 = pnand %p338_p2, %p108_p3  ;;  %p30_p8 = scmp.ge.s32.totalorder %s28_s22, 2 }
   0xa   : > { %s526_s23 = smov [#allocation4]   ;;  %s58_s24 = sadd.s32 1, %s512_s11 }
   0xb   : > { %p359_p6 = pneg %p589_p5  ;;  %s666_s22 = smov (%p30_p8, %s28_s22), 0 }
   0xc   : > { %p65_p9 = scmp.ne.s32.totalorder %s512_s11, %s508_s10  ;;  %s53_s25 = ssub.s32 %s520_s13, %s666_s22 }
   0xd   : > { %p360_p7 = pnand %p359_p6, %p574_p1  ;;  %p66_p10 = scmp.eq.s32.totalorder %s524_s14, 0 }
   0xe   : > { %p56_p11 = scmp.eq.s32.totalorder %s53_s25, 0  ;;  %p368_p12 = scmp.lt.s32.totalorder %s524_s14, 2 }
   0xf   : > { %362 = dma.hbm_to_smem (!%p360_p7), %s121_s20, 16, %s526_s23, [#allocation6]  }
  0x10   : > { %s131_s26 = sand.u32 1, %s512_s11   ;;  %s352_s27 = sshll.u32 %s520_s13, 4 }
  0x11   : > { %s610_s28 = scalar_select %p56_p11, %s512_s11, %s58_s24  }
  0x12   : > { %p67_p13 = por %p66_p10, %p65_p9  ;;  %s341_s29 = sshll.u32 %s131_s26, 4 }
  0x13   : > { %s142_s4 = scalar_lea.hbm %s655_s1, %s352_s27  ;;  %s135_s6 = scalar_lea.vmem [#allocation7], %s341_s29 }
  0x14   : > { %s144_s5 = sshll.u32 %s142_s4, 4  ;;  %s146_s7 = sshll.u32 %s135_s6, 4  ;;  %s145_s5 = int_to_ptr.hbm [resolvable:$true] %s144_s5  ;;  %s147_s7 = int_to_ptr.vmem [resolvable:$true] %s146_s7 }
  0x15   : > { %p364_p0 = pnand %p368_p12, %p67_p13  ;;  %s132_s8 = scalar_lea.sflag [#allocation5], %s131_s26 }
  0x16   : > { %155 = sbr.rel (%p589_p5) target bundleno = 204 (0xcc), region = 28 }
  0x17   : > { %366 = dma.hbm_to_vmem [thread:$0]  (!%p364_p0), %s145_s5, 256, %s147_s7, %s132_s8  }
  0x1b   : > { %495 = dma.done.wait (%p574_p1), [#allocation6], 16  }
  0x1c   : > { %497 = vsyncadd (%p574_p1), [#allocation6], 4294967280  ;;  %s162_s9 = sand.u32 1, %s508_s10  }
  0x1d   : > { %s346_s15 = sshll.u32 %s162_s9, 4  ;;  %s163_s18 = scalar_lea.sflag [#allocation5], %s162_s9 }
  0x1e   : > { %s166_s19 = scalar_lea.vmem [#allocation7], %s346_s15 }
  0x1f   : > { %499 = dma.done.wait (%p582_p4), %s163_s18, 256  }
  0x20   : > { %501 = vsyncadd (%p582_p4), %s163_s18, 4294967040 }
  0x21   : > { %172 = sfence }
  0x22   : > { %v200_v0 = vld [vmem:[%s166_s19] sm:$0xff]  ;;  %v201_v1 = vld [vmem:[%s166_s19 + $0x8] sm:$0xff]  ;;  %vm197_vm0 = vcmask 7168   ;;  %v527_v4 = vmov 0.0   ;;  %v528_v5 = vmov -inf   ;;  %s348_s16 = sld [smem:[#allocation4 + $0x1]] }
  0x23   : > { %v210_v2 = vadd.f32 %v201_v1, %v200_v0  ;;  %v203_v3 = vmax.f32 %v200_v0, %v201_v1  ;;  %199 = vst.msk [vmem:[#allocation3] sm:$0xff] %vm197_vm0, %v527_v4  ;;  %s218_s17 = sld [smem:[#allocation4]]  ;;  %p189_p1 = scmp.lt.s32.totalorder %s516_s12, 1 }
  0x24   : > { %198 = vst.msk [vmem:[#allocation2] sm:$0xff] %vm197_vm0, %v528_v5 }
  0x25   : > { %211 = vadd.xlane.f32.xlu0 %v210_v2  ;;  %s668_s12 = smov (!%p189_p1, %s516_s12), 1 }
  0x26   : > { %s347_s20 = sshll.u32 %s668_s12, 3 }
  0x27   : > { %s192_s24 = scalar_lea.vmem %s656_s2, %s347_s20 }
  0x28   : > { %v225_v14 = vstv %s348_s16 }
  0x29   : > { %v220_v15 = vstv %s218_s17 }
  0x2a   : > { %v209_v6 = vld [vmem:[#allocation3] sm:$0xff] }
  0x2b   : > { %v202_v9 = vld [vmem:[#allocation2] sm:$0xff] }
  0x2d   : > { %204 = vmax.xlane.f32.xlu0 %v203_v3 }
  0x98   : > { %v212_v7 = vpop.xlane.xlu0 %211 }
  0x99   : > { %v213_v8 = vadd.f32 %v212_v7, %v209_v6 }
  0x9b   : > { %214 = vst.msk [vmem:[#allocation3] sm:$0xff] %vm197_vm0, %v213_v8 }
  0xa0   : > { %v205_v10 = vpop.xlane.xlu0 %204 }
  0xa1   : > { %v206_v11 = vmax.f32 %v202_v9, %v205_v10 }
  0xa2   : > { %v223_v12 = vld [vmem:[#allocation3] sm:$0xff] }
  0xa3   : > { %208 = vst.msk [vmem:[#allocation2] sm:$0xff] %vm197_vm0, %v206_v11  ;;  %v224_v13 = vmul.f32 0.00390625, %v223_v12 }
  0xa5   : > { %v226_v17 = vmul.f32 %v225_v14, %v224_v13 }
  0xaa   : > { %v219_v16 = vld [vmem:[#allocation2] sm:$0xff] }
  0xab   : > { %v221_v18 = vmul.f32 %v220_v15, %v219_v16 }
  0xad   : > { %v227_v19 = vadd.f32 %v226_v17, %v221_v18 }
  0xaf   : > { %v349_v20 = vmul.f32 -1.442695, %v227_v19 }
  0xb1   : > { %421 = vpow2.f32 %v349_v20 }
  0xb7   : > { %v422_v21 = vpop.eup %421 }
  0xb8   : > { %v231_v22 = vadd.f32 1.0, %v422_v21 }
  0xba   : > { %423 = vrcp.f32 %v231_v22  ;;  %v243_v26 = vand.u32 2147483648, %v231_v22  ;;  %v241_v28 = vand.u32 2147483647, %v231_v22  ;;  %vm237_vm2 = vweird.f32 %v231_v22 }
  0xbc   : > { %v244_v30 = vor.u32 1.1754944e-38, %v243_v26  ;;  %vm242_vm4 = vcmp.eq.f32.partialorder %v241_v28, 8.507059e+37 }
  0xc0   : > { %v424_v23 = vpop.eup %423 }
  0xc1   : > { %v233_v24 = vmul.f32 %v424_v23, %v231_v22  ;;  %vm238_vm1 = vweird.f32 %v424_v23 }
  0xc2   : > { %vm239_vm3 = vmor %vm237_vm2, %vm238_vm1 }
  0xc3   : > { %v234_v25 = vsub.f32 1.0, %v233_v24 }
  0xc5   : > { %v235_v27 = vmul.f32 %v424_v23, %v234_v25 }
  0xc7   : > { %v236_v29 = vadd.f32 %v424_v23, %v235_v27 }
  0xc9   : > { %v240_v31 = vsel %vm239_vm3, %v424_v23, %v236_v29 }
  0xca   : > { %v245_v32 = vsel %vm242_vm4, %v244_v30, %v240_v31 }
  0xcb   : > { %247 = vst.msk [vmem:[%s192_s24] sm:$0xff] %vm197_vm0, %v245_v32 }
  0xcc PF: > { %s16_s14 = sadd.s32 1, %s524_s14   ;;  %s660_s9 = smov %s508_s10 }
  0xcd   : > { %p13_p2 = scmp.ge.s32.totalorder %s16_s14, 4   ;;  %s661_s10 = smov %s512_s11 }
  0xce   : > { %s662_s11 = smov %s610_s28  ;;  %s663_s12 = smov %s520_s13 }
  0xcf   : > { %s664_s13 = smov %s666_s22  ;;  %15 = sbr.rel (!%p13_p2) target bundleno = 5 (0x5), region = 81 }
  0xd4   :  { %267 = vsyncpa [#allocation5], 1 }
  0xd5   :  { %269 = vsyncpa [#allocation5 + $0x1], 1 }
  0xd6   :  { %270 = vsyncpa [#allocation6], 1 }
  0xd7   :  { %272 = vsyncpa [#allocation6 + $0x1], 1 }

</bundles_post_ra>
